<compile_context>
chip_gen: v5e
topology: v5e:2x2
jax: 0.10.0
libtpu: 0.0.40
codegen_flags: <defaults>
</compile_context>

<pallas_src>
import functools

import jax
import jax.numpy as jnp
from jax.experimental import pallas as pl
from jax.experimental.pallas import tpu as pltpu

_LANES = 128
_ACC_SUBLANES = 8


def _frob_kernel(x_ref, y_ref, o_ref, acc_ref, *,
                 rows_valid, block_rows, blocks_per_outer, need_mask):
    o = pl.program_id(0)          # outer ("parallel") axis: per-core partial
    i = pl.program_id(1)          # inner ("arbitrary") axis: streaming blocks

    @pl.when(i == 0)
    def _():
        acc_ref[...] = jnp.zeros_like(acc_ref)

    d = x_ref[...].astype(jnp.float32) - y_ref[...].astype(jnp.float32)
    sq = d * d
    g = o * blocks_per_outer + i  # unclamped global block index

    def _accumulate(vals):
        # (br,128) -> (br/8, 8, 128) is a pure leading-dim split (layout
        # no-op); summing axis 0 is a VALU add-tree of (8,128) vreg slabs,
        # then one tiny accumulate into the resident scratch.
        acc_ref[...] += vals.reshape(-1, _ACC_SUBLANES, _LANES).sum(axis=0)

    if need_mask:
        # Only the globally-last (ragged) block and any duplicated overhang
        # block need masking; interior blocks take the mask-free path.
        is_edge = (g + 1) * block_rows > rows_valid

        @pl.when(is_edge)
        def _():
            row_ids = g * block_rows + jax.lax.broadcasted_iota(
                jnp.int32, sq.shape, 0)
            _accumulate(jnp.where(row_ids < rows_valid, sq, 0.0))

        @pl.when(jnp.logical_not(is_edge))
        def _():
            _accumulate(sq)
    else:
        _accumulate(sq)

    @pl.when(i == pl.num_programs(1) - 1)
    def _():
        o_ref[...] = acc_ref[...]


def frobenius_loss(inputs, targets, *, block_rows=None,
                   target_block_bytes=2 * 1024 * 1024):
    """sqrt(sum((inputs.ravel() - targets.ravel())**2)) via a Pallas reduction."""
    x = inputs.reshape(-1)
    y = targets.reshape(-1)
    assert x.shape == y.shape, "inputs and targets must have the same numel"
    n = x.shape[0]
    if n == 0:
        return jnp.asarray(0.0, jnp.float32)

    itemsize = int(jnp.dtype(x.dtype).itemsize)
    pack = max(8, 32 // max(itemsize, 1))   # sublanes/tile: f32 8, bf16 16, i8 32

    # Pad the flat length to a multiple of pack*128 (at most pack*128-1 zeros,
    # which contribute 0 to the sum).  No large HBM pad ever happens.
    rows = -(-n // _LANES)
    rows = -(-rows // pack) * pack
    padded = rows * _LANES
    if padded != n:
        pad = padded - n
        x = jnp.concatenate([x, jnp.zeros((pad,), x.dtype)])
        y = jnp.concatenate([y, jnp.zeros((pad,), y.dtype)])
    x = x.reshape(rows, _LANES)
    y = y.reshape(rows, _LANES)

    # Block size: dtype-aware so every dtype streams ~target_block_bytes per
    # input per step.
    if block_rows is None:
        block_rows = max(pack, target_block_bytes // (_LANES * itemsize))
    if rows <= block_rows:
        br = rows                                  # single full-extent block
    else:
        br = max(pack, (min(block_rows, rows) // pack) * pack)

    num_blocks = -(-rows // br)

    # 2-way outer split for v7x megacore; harmless (sequential) on v5e/v6e.
    n_outer = 2 if num_blocks >= 2 else 1
    bpo = -(-num_blocks // n_outer)
    # Mask needed if the grid's row coverage exceeds the real row count
    # (ragged last block and/or duplicated overhang block).
    need_mask = (n_outer * bpo * br) != rows

    kernel = functools.partial(
        _frob_kernel, rows_valid=rows, block_rows=br,
        blocks_per_outer=bpo, need_mask=need_mask)

    def in_map(o, i):
        # Clamp so the DMA never starts past the array end; the in-kernel mask
        # zeroes any duplicated / ragged rows of the clamped block.
        return (jnp.minimum(o * bpo + i, num_blocks - 1), 0)

    partials = pl.pallas_call(
        kernel,
        out_shape=jax.ShapeDtypeStruct((n_outer * _ACC_SUBLANES, _LANES),
                                       jnp.float32),
        grid_spec=pltpu.PrefetchScalarGridSpec(
            num_scalar_prefetch=0,
            grid=(n_outer, bpo),
            in_specs=[
                pl.BlockSpec((br, _LANES), in_map),
                pl.BlockSpec((br, _LANES), in_map),
            ],
            out_specs=pl.BlockSpec((_ACC_SUBLANES, _LANES),
                                   lambda o, i: (o, 0)),
            scratch_shapes=[pltpu.VMEM((_ACC_SUBLANES, _LANES), jnp.float32)],
        ),
        compiler_params=pltpu.CompilerParams(
            dimension_semantics=("parallel", "arbitrary"),
        ),
    )(x, y)

    # Tiny (n_outer*8 x 128) combine + sqrt in XLA.
    return jnp.sqrt(jnp.sum(partials))


def _ref_loss(a, b):
    d = a.reshape(-1).astype(jnp.float32) - b.reshape(-1).astype(jnp.float32)
    return jnp.sqrt(jnp.sum(d * d))


if __name__ == "__main__":
    key = jax.random.PRNGKey(0)
    k1, k2, k3, k4, k5, k6, k7, k8 = jax.random.split(key, 8)

    # Primary small NCHW example (shape is irrelevant to the loss -- it flattens).
    inputs = jax.random.normal(k1, (2, 4, 16, 16), dtype=jnp.float32)
    targets = jax.random.normal(k2, (2, 4, 16, 16), dtype=jnp.float32)
    loss = frobenius_loss(inputs, targets)
    jax.block_until_ready(loss)
    assert jnp.allclose(loss, _ref_loss(inputs, targets), rtol=1e-5, atol=1e-5), (
        loss, _ref_loss(inputs, targets))

    # numel not a multiple of 128 (exercises the tiny tail pad).
    a2 = jax.random.normal(k3, (3, 5, 7, 11), dtype=jnp.float32)
    b2 = jax.random.normal(k4, (3, 5, 7, 11), dtype=jnp.float32)
    l2 = frobenius_loss(a2, b2)
    jax.block_until_ready(l2)
    assert jnp.allclose(l2, _ref_loss(a2, b2), rtol=1e-5, atol=1e-5), (
        l2, _ref_loss(a2, b2))

    # Multi-block grid with 2-way outer split and a ragged last block
    # (exercises the in-kernel mask + megacore-split path).
    a3 = jax.random.normal(k5, (2, 4, 16, 20), dtype=jnp.float32)  # 2560 elems
    b3 = jax.random.normal(k6, (2, 4, 16, 20), dtype=jnp.float32)
    l3 = frobenius_loss(a3, b3, block_rows=16)
    jax.block_until_ready(l3)
    assert jnp.allclose(l3, _ref_loss(a3, b3), rtol=1e-5, atol=1e-5), (
        l3, _ref_loss(a3, b3))

    # Multiple inner blocks per outer group, no masking.
    a4 = jax.random.normal(k7, (8, 8, 32, 32), dtype=jnp.float32)  # 512 rows
    b4 = jax.random.normal(k8, (8, 8, 32, 32), dtype=jnp.float32)
    l4 = frobenius_loss(a4, b4, block_rows=64)
    jax.block_until_ready(l4)
    assert jnp.allclose(l4, _ref_loss(a4, b4), rtol=1e-5, atol=1e-5), (
        l4, _ref_loss(a4, b4))

    # bf16 inputs stream natively (16-row sublane packing), f32 accumulation.
    a5 = inputs.astype(jnp.bfloat16)
    b5 = targets.astype(jnp.bfloat16)
    l5 = frobenius_loss(a5, b5)
    jax.block_until_ready(l5)
    assert jnp.allclose(l5, _ref_loss(a5, b5), rtol=1e-5, atol=1e-5), (
        l5, _ref_loss(a5, b5))

    print("KERNEL_OK")
</pallas_src>

<mosaic_0001>
module attributes {stable_mosaic.version = 11 : i64} {
  func.func @_frob_kernel(%arg0: i32, %arg1: i32, %arg2: memref<16x128xf32, #tpu.memory_space<vmem>>, %arg3: memref<16x128xf32, #tpu.memory_space<vmem>>, %arg4: memref<8x128xf32, #tpu.memory_space<vmem>>, %arg5: memref<8x128xf32, #tpu.memory_space<vmem>>) attributes {dimension_semantics = [#tpu.dimension_semantics<parallel>, #tpu.dimension_semantics<arbitrary>], iteration_bounds = array<i64: 1, 1>, scalar_prefetch = 0 : i64, scratch_operands = 1 : i64, tpu.core_type = #tpu.core_type<tc>, window_params = [{transform_indices = @transform_0, window_bounds = array<i64: 16, 128>}, {transform_indices = @transform_1, window_bounds = array<i64: 16, 128>}, {transform_indices = @transform_2, window_bounds = array<i64: 8, 128>}]} {
    %c0_i32 = arith.constant 0 : i32
    %0 = arith.cmpi eq, %arg1, %c0_i32 : i32
    %1 = arith.extui %0 : i1 to i32
    %c0_i32_0 = arith.constant 0 : i32
    %2 = arith.cmpi ne, %1, %c0_i32_0 : i32
    scf.if %2 {
      %cst_10 = arith.constant 0.000000e+00 : f32
      %15 = vector.broadcast %cst_10 : f32 to vector<8x128xf32>
      %c0_11 = arith.constant 0 : index
      %c0_12 = arith.constant 0 : index
      %16 = vector.load %arg5[%c0_11, %c0_12] : memref<8x128xf32, #tpu.memory_space<vmem>>, vector<8x128xf32>
      tpu.vector_store %arg5[%c0_11, %c0_12], %15 {strides = array<i32>} : memref<8x128xf32, #tpu.memory_space<vmem>>, vector<8x128xf32>,
    } else {
    }
    %c0 = arith.constant 0 : index
    %c0_1 = arith.constant 0 : index
    %3 = vector.load %arg2[%c0, %c0_1] : memref<16x128xf32, #tpu.memory_space<vmem>>, vector<16x128xf32>
    %c0_2 = arith.constant 0 : index
    %c0_3 = arith.constant 0 : index
    %4 = vector.load %arg3[%c0_2, %c0_3] : memref<16x128xf32, #tpu.memory_space<vmem>>, vector<16x128xf32>
    %5 = arith.subf %3, %4 : vector<16x128xf32>
    %6 = arith.mulf %5, %5 : vector<16x128xf32>
    %c0_4 = arith.constant 0 : index
    %c0_5 = arith.constant 0 : index
    %7 = vector.load %arg5[%c0_4, %c0_5] : memref<8x128xf32, #tpu.memory_space<vmem>>, vector<8x128xf32>
    %8 = vector.shape_cast %6 : vector<16x128xf32> to vector<2x8x128xf32>
    %cst = arith.constant dense<0.000000e+00> : vector<8x128xf32>
    %9 = vector.multi_reduction <add>, %8, %cst [0] : vector<2x8x128xf32> to vector<8x128xf32>
    %10 = arith.addf %7, %9 : vector<8x128xf32>
    %c0_6 = arith.constant 0 : index
    %c0_7 = arith.constant 0 : index
    %11 = vector.load %arg5[%c0_6, %c0_7] : memref<8x128xf32, #tpu.memory_space<vmem>>, vector<8x128xf32>
    tpu.vector_store %arg5[%c0_6, %c0_7], %10 {strides = array<i32>} : memref<8x128xf32, #tpu.memory_space<vmem>>, vector<8x128xf32>,
    %c0_i32_8 = arith.constant 0 : i32
    %12 = arith.cmpi eq, %arg1, %c0_i32_8 : i32
    %13 = arith.extui %12 : i1 to i32
    %c0_i32_9 = arith.constant 0 : i32
    %14 = arith.cmpi ne, %13, %c0_i32_9 : i32
    scf.if %14 {
      %c0_10 = arith.constant 0 : index
      %c0_11 = arith.constant 0 : index
      %15 = vector.load %arg5[%c0_10, %c0_11] : memref<8x128xf32, #tpu.memory_space<vmem>>, vector<8x128xf32>
      %c0_12 = arith.constant 0 : index
      %c0_13 = arith.constant 0 : index
      %16 = vector.load %arg4[%c0_12, %c0_13] : memref<8x128xf32, #tpu.memory_space<vmem>>, vector<8x128xf32>
      tpu.vector_store %arg4[%c0_12, %c0_13], %15 {strides = array<i32>} : memref<8x128xf32, #tpu.memory_space<vmem>>, vector<8x128xf32>,
    } else {
    }
    return
  }
  func.func @transform_0(%arg0: i32, %arg1: i32) -> (i32, i32) {
    %c1_i32 = arith.constant 1 : i32
    %0 = arith.muli %arg0, %c1_i32 : i32
    %1 = arith.addi %0, %arg1 : i32
    %c0_i32 = arith.constant 0 : i32
    %2 = arith.minsi %1, %c0_i32 : i32
    %c0_i32_0 = arith.constant 0 : i32
    %c0_i32_1 = arith.constant 0 : i32
    return %2, %c0_i32_0 : i32, i32
  }
  func.func @transform_1(%arg0: i32, %arg1: i32) -> (i32, i32) {
    %c1_i32 = arith.constant 1 : i32
    %0 = arith.muli %arg0, %c1_i32 : i32
    %1 = arith.addi %0, %arg1 : i32
    %c0_i32 = arith.constant 0 : i32
    %2 = arith.minsi %1, %c0_i32 : i32
    %c0_i32_0 = arith.constant 0 : i32
    %c0_i32_1 = arith.constant 0 : i32
    return %2, %c0_i32_0 : i32, i32
  }
  func.func @transform_2(%arg0: i32, %arg1: i32) -> (i32, i32) {
    %c0_i32 = arith.constant 0 : i32
    %c0_i32_0 = arith.constant 0 : i32
    return %arg0, %c0_i32 : i32, i32
  }
}

</mosaic_0001>

<bundles_post_ra>
// kernel: tpu_custom_call.1
= control target key start
LH: loop header
LB: loop body
LE: loop exit
PB: predicated region body
PF: predicated region fallthrough
CT: control target
= control target key end

     0   :  { %7 = vsyncpa [#allocation4], 0  ;;  %s220_s0 = inlined_call_operand.hbm [shape: f32[16,128], index: 0, kind: input, shape index: {}]   ;;  %s221_s1 = inlined_call_operand.hbm [shape: f32[16,128], index: 1, kind: input, shape index: {}]   ;;  %s222_s2 = inlined_call_operand.hbm [shape: f32[8,128], index: 2, kind: output, shape index: {}]  }
   0x1   :  { %8 = vsyncpa [#allocation7], 0 }
   0x2   :  { %9 = vsyncpa [#allocation5], 0  ;;  %s20_s11 = sshll.u32 %s220_s0, 4  ;;  %s191_s12 = smov [#allocation3]   ;;  %s21_s11 = int_to_ptr.hbm [resolvable:$true] %s20_s11 }
   0x3   :  { %s22_s13 = sshll.u32 %s191_s12, 4  ;;  %s39_s16 = sshll.u32 %s221_s1, 4  ;;  %s23_s13 = int_to_ptr.vmem [resolvable:$true] %s22_s13  ;;  %s40_s16 = int_to_ptr.hbm [resolvable:$true] %s39_s16 }
   0x4   :  { %s192_s17 = smov 128   ;;  %s193_s18 = smov 8  }
   0x5   :  { %28 = dma.hbm_to_vmem [thread:$0]  %s21_s11, 256, %s23_s13, [#allocation4], %s192_s17, %s192_s17, %s193_s18  }
   0x6   :  { %s194_s19 = smov [#allocation6]  }
   0x7   :  { %s41_s20 = sshll.u32 %s194_s19, 4  ;;  %s42_s20 = int_to_ptr.vmem [resolvable:$true] %s41_s20 }
   0x8   :  { %47 = dma.hbm_to_vmem [thread:$0]  %s40_s16, 256, %s42_s20, [#allocation7], %s192_s17, %s192_s17, %s193_s18  }
   0x9   :  { %185 = dma.done.wait [#allocation4], 256  }
   0xa   :  { %186 = vsyncadd [#allocation4], 4294967040 }
   0xb   :  { %187 = dma.done.wait [#allocation7], 256  }
   0xc   :  { %188 = vsyncadd [#allocation7], 4294967040  ;;  %v69_v0 = vld [vmem:[#allocation3] sm:$0xff]  ;;  %v70_v1 = vld [vmem:[#allocation3 + $0x8] sm:$0xff]  ;;  %s195_s0 = smov [#allocation8]   ;;  %s93_s23 = sshll.u32 %s222_s2, 4  ;;  %s94_s23 = int_to_ptr.hbm [resolvable:$true] %s93_s23 }
   0xd   :  { %v71_v2 = vld [vmem:[#allocation6] sm:$0xff]  ;;  %v72_v3 = vld [vmem:[#allocation6 + $0x8] sm:$0xff]  ;;  %s91_s1 = sshll.u32 %s195_s0, 4  ;;  %s92_s1 = int_to_ptr.vmem [resolvable:$true] %s91_s1 }
   0xe   :  { %v73_v4 = vsub.f32 %v69_v0, %v71_v2  ;;  %v74_v5 = vsub.f32 %v70_v1, %v72_v3 }
  0x10   :  { %v75_v6 = vmul.f32 %v73_v4, %v73_v4  ;;  %v76_v7 = vmul.f32 %v74_v5, %v74_v5 }
  0x12   :  { %v78_v8 = vadd.f32 %v76_v7, %v75_v6 }
  0x14   :  { %85 = vst [vmem:[#allocation8] sm:$0xff] %v78_v8 }
  0x15   :  { %96 = dma.vmem_to_hbm [thread:$0]  %s92_s1, 128, %s94_s23, [#allocation5]  }
  0x16   :  { %189 = dma.done.wait [#allocation5], 128  }
  0x17   :  { %190 = vsyncadd [#allocation5], 4294967168 }
  0x18   :  { %101 = vsyncpa [#allocation4], 1 }
  0x19   :  { %102 = vsyncpa [#allocation7], 1 }
  0x1a   :  { %103 = vsyncpa [#allocation5], 1 }

</bundles_post_ra>
